<compile_context>
chip_gen: v7x
topology: tpu7x:2x2x1
jax: 0.10.0
libtpu: 0.0.40
codegen_flags: <defaults>
</compile_context>

<pallas_src>
import functools

import jax
import jax.numpy as jnp
from jax.experimental import pallas as pl
from jax.experimental.pallas import tpu as pltpu

EPS = 1e-8       # matches the module's eps
LN_EPS = 1e-5    # nn.LayerNorm default eps


def _wave_network_kernel(emb_ref, w12_ref, b12_ref, gamma_ref, beta_ref,
                         wc_ref, bc_ref, out_ref, *, mode):
    bb, S, D = emb_ref.shape
    rows = bb * S
    seq_f = jnp.float32(S)

    x = emb_ref[...].reshape(rows, D)                       # (BB*S, D) f32

    # One fused MXU dot for both linear layers: (rows, D) @ (D, 2D) + b.
    zz = jnp.dot(x, w12_ref[...],
                 preferred_element_type=jnp.float32) + b12_ref[...]
    zz = zz.reshape(bb, S, 2 * D)

    # Per-(batch, dim) sequence energies e = sum_s z^2 and global semantics
    # g = sqrt(e).  Note |c| == g at every sequence position.
    ee = jnp.sum(zz * zz, axis=1)                           # (BB, 2D)
    e1 = ee[:, :D]
    e2 = ee[:, D:]
    g1 = jnp.sqrt(e1)                                       # (BB, D)
    g2 = jnp.sqrt(e2)

    if mode == "interference":
        e1b = e1.reshape(bb, 1, D)
        e2b = e2.reshape(bb, 1, D)
        esum = e1b + e2b
        gg2 = (2.0 * (g1 * g2)).reshape(bb, 1, D)
        # Divides stay on the tiny (BB,1,D) rows; the (BB,S,D) ratios are muls.
        inv_g1 = (1.0 / (g1 + EPS)).reshape(bb, 1, D)
        inv_g2 = (1.0 / (g2 + EPS)).reshape(bb, 1, D)
        z1 = zz[:, :, :D]
        z2 = zz[:, :, D:]
        r1 = z1 * inv_g1
        r2 = z2 * inv_g2
        # |c1 + c2|^2 = e1 + e2 + 2*g1*g2*(cos1*cos2 + sin1*sin2) with
        # cos == ratio (|ratio| < 1 always since g >= |z| per position) and
        # sin == sqrt(clip(1 - ratio^2, 0, 1)); the two sines fuse into a
        # single sqrt of the clipped product -> 2 sqrt/element total.
        cross = r1 * r2 + jnp.sqrt(
            jnp.clip(1.0 - r1 * r1, 0.0, 1.0) *
            jnp.clip(1.0 - r2 * r2, 0.0, 1.0))
        rabs = jnp.sqrt(esum + gg2 * cross)                 # |c1 + c2|
        # torch.abs(result * sqrt(total_energy) / (|result| + eps)).
        scale = jnp.sqrt(seq_f * esum)                      # (BB, 1, D)
        # TODO(synk): approx=True (EUP vrcp) once the 1e-3 tol is re-validated.
        out = (rabs * scale) * pl.reciprocal(rabs + EPS, approx=False)
        # LayerNorm over the embedding dim, then mean-pool over the sequence.
        mean = jnp.mean(out, axis=-1, keepdims=True)
        cent = out - mean
        var = jnp.mean(cent * cent, axis=-1, keepdims=True)
        normed = (cent * jax.lax.rsqrt(var + LN_EPS)
                  * gamma_ref[...] + beta_ref[...])
        pooled = jnp.mean(normed, axis=1)                   # (BB, D)
    else:  # 'modulation'
        # |c1*c2| = g1*g2 at every position (constant over the sequence) and
        # sqrt(te1*te2) = S*g1*g2, so the whole post-matmul stage collapses to
        # one (BB, D) row; LayerNorm of identical rows is the row itself and
        # the sequence mean-pool is a no-op.
        g12 = g1 * g2                                       # (BB, D)
        row = g12 * ((seq_f * g12) / (g12 + EPS))           # abs(rescaled c1*c2)
        mean = jnp.mean(row, axis=-1, keepdims=True)
        cent = row - mean
        var = jnp.mean(cent * cent, axis=-1, keepdims=True)
        pooled = (cent * jax.lax.rsqrt(var + LN_EPS)
                  * gamma_ref[...] + beta_ref[...])         # (BB, D)

    # Lane-dense classifier: one (BB, D) @ (D, Cpad) dot, unmasked store.
    out_ref[...] = (jnp.dot(pooled, wc_ref[...],
                            preferred_element_type=jnp.float32) + bc_ref[...])


def _vmem_capacity_bytes():
    """Physical VMEM capacity; falls back to the v7x-safe 64 MiB."""
    try:
        return int(pltpu.get_tpu_info().vmem_capacity_bytes)
    except Exception:
        return 64 * 1024 * 1024


def _pick_block_batch(B, S, D, Cp, mode, budget_bytes):
    """Largest batch block BB that (a) divides B, (b) keeps the (BB, Cp)
    output block sublane-legal (BB == B or BB % 8 == 0) and (c) fits a VMEM
    byte budget covering the double-buffered emb/out blocks, the
    double-buffered grid-invariant weights and the live temporaries.  Among
    fitting sizes, prefer >= 2 (ideally even) grid steps so v7x can shard the
    parallel batch axis across its 2 TensorCores."""
    f32 = 4
    weights = 2 * f32 * (D * 2 * D + 2 * D + 2 * D + D * Cp + Cp)

    def block_bytes(bb):
        rows = bb * S
        emb = 2 * f32 * rows * D            # double-buffered input block
        outb = 2 * f32 * bb * Cp            # double-buffered output block
        zzb = f32 * rows * 2 * D            # fused linear result
        live = (5 if mode == "interference" else 2) * f32 * rows * D
        return emb + outb + zzb + live + weights

    valid = [d for d in range(1, B + 1)
             if B % d == 0 and (d == B or d % 8 == 0)]
    fits = [d for d in valid if block_bytes(d) <= budget_bytes]
    if fits:
        even = [d for d in fits if B // d >= 2 and (B // d) % 2 == 0]
        multi = [d for d in fits if B // d >= 2]
        if even:
            return max(even)
        if multi:
            return max(multi)
        return max(fits)
    # Nothing fits: the smallest legal block spills least.
    # TODO(synk): tile the sequence axis (grid-accumulated e1/e2) so very long
    # S / large D always fits the v7x 64 MiB budget.
    return min(valid)


def wave_network_forward(input_ids, params, mode="modulation", block_batch=None):
    emb_w, w1, b1, w2, b2, gamma, beta, wc, bc = params
    B, S = input_ids.shape
    D = emb_w.shape[1]
    C = wc.shape[1]

    if D % 128 != 0:
        # The fused (rows, 2D) result is split at column D; that slice is only
        # layout-clean on a 128-lane boundary (review correctness concern).
        raise ValueError(f"embedding_dim must be a multiple of 128, got {D}")

    # Embedding lookup (gather) stays in plain JAX — glue, not the hot path.
    # TODO(synk): fuse the gather via scalar-prefetched ids + manual DMA from
    # the HBM table to avoid the (B,S,D) activation HBM round-trip (v5e win).
    emb = emb_w[input_ids].astype(jnp.float32)              # (B, S, D)

    # Fuse W1 || W2 (and b1 || b2) so the kernel issues a single (D, 2D) dot.
    w12 = jnp.concatenate([w1, w2], axis=1)                 # (D, 2D)
    b12 = jnp.concatenate([b1, b2], axis=1)                 # (1, 2D)

    # Lane-dense classifier tail: zero-pad C up to a multiple of 128 so the
    # kernel's (BB, Cp) store is an unmasked full-lane vst; slice outside.
    Cp = ((C + 127) // 128) * 128
    wc_p = jnp.zeros((D, Cp), jnp.float32).at[:, :C].set(wc)
    bc_p = jnp.zeros((1, Cp), jnp.float32).at[:, :C].set(bc)

    # VMEM-aware sizing: ~80% of physical capacity as the scoped limit and
    # ~85% of that as the block budget (headroom for compiler scratch).
    vmem_cap = _vmem_capacity_bytes()
    vmem_limit = int(vmem_cap * 0.8)
    bb = block_batch or _pick_block_batch(B, S, D, Cp, mode,
                                          int(vmem_limit * 0.85))
    grid = (B // bb,)

    kernel = functools.partial(_wave_network_kernel, mode=mode)
    out = pl.pallas_call(
        kernel,
        out_shape=jax.ShapeDtypeStruct((B, Cp), jnp.float32),
        grid_spec=pltpu.PrefetchScalarGridSpec(
            num_scalar_prefetch=0,
            grid=grid,
            in_specs=[
                pl.BlockSpec((bb, S, D), lambda b: (b, 0, 0)),   # embeddings
                pl.BlockSpec((D, 2 * D), lambda b: (0, 0)),      # W1||W2
                pl.BlockSpec((1, 2 * D), lambda b: (0, 0)),      # b1||b2
                pl.BlockSpec((1, D), lambda b: (0, 0)),          # LN gamma
                pl.BlockSpec((1, D), lambda b: (0, 0)),          # LN beta
                pl.BlockSpec((D, Cp), lambda b: (0, 0)),         # classifier W
                pl.BlockSpec((1, Cp), lambda b: (0, 0)),         # classifier b
            ],
            out_specs=pl.BlockSpec((bb, Cp), lambda b: (b, 0)),
        ),
        # "parallel": lets v7x shard the batch grid across its 2 TensorCores;
        # harmless on single-TC v5e/v6e.  Further levers left off pending
        # tolerance / lowering re-validation: pipeline_mode=pl.Buffered(1) on
        # the grid-invariant weight specs and bf16 casts on the MXU operands.
        compiler_params=pltpu.CompilerParams(
            dimension_semantics=("parallel",),
            vmem_limit_bytes=vmem_limit),
    )(emb, w12, b12, gamma, beta, wc_p, bc_p)
    return out[:, :C]                                        # (B, C)


def init_params(key, vocab_size, D, C):
    """Deterministic parameter init matching the module's __init__ shapes."""
    k_emb, k_w1, k_w2, k_wc, k_bc = jax.random.split(key, 5)

    # Embedding: uniform(-0.1, 0.1); "frequency" init reduces to row-wise L2
    # norm (magnitude * cos(angle(real)) == w / ||w||_2 per row).
    emb_w = jax.random.uniform(k_emb, (vocab_size, D), minval=-0.1, maxval=0.1,
                               dtype=jnp.float32)
    emb_w = emb_w / jnp.sqrt(jnp.sum(emb_w ** 2, axis=1, keepdims=True))

    def orthogonal(k):
        a = jax.random.normal(k, (D, D), dtype=jnp.float32)
        q, r = jnp.linalg.qr(a)
        return q * jnp.sign(jnp.diagonal(r))[None, :]

    w1 = orthogonal(k_w1)                  # (D_in, D_out), orthogonal
    w2 = orthogonal(k_w2)
    b1 = jnp.zeros((1, D), jnp.float32)
    b2 = jnp.zeros((1, D), jnp.float32)

    gamma = jnp.ones((1, D), jnp.float32)  # nn.LayerNorm defaults
    beta = jnp.zeros((1, D), jnp.float32)

    bound = 1.0 / jnp.sqrt(jnp.float32(D))  # nn.Linear default-ish init
    wc = jax.random.uniform(k_wc, (D, C), minval=-bound, maxval=bound,
                            dtype=jnp.float32)
    bc = jax.random.uniform(k_bc, (1, C), minval=-bound, maxval=bound,
                            dtype=jnp.float32)
    return (emb_w, w1, b1, w2, b2, gamma, beta, wc, bc)


def _reference_forward(input_ids, params, mode="modulation"):
    """Pure-JAX reference mirroring the PyTorch forward (correctness check)."""
    emb_w, w1, b1, w2, b2, gamma, beta, wc, bc = params
    x = emb_w[input_ids]                                  # (B, S, D)
    z1 = x @ w1 + b1
    z2 = x @ w2 + b2
    g1 = jnp.sqrt(jnp.sum(z1 ** 2, axis=1, keepdims=True))
    g2 = jnp.sqrt(jnp.sum(z2 ** 2, axis=1, keepdims=True))

    def to_c(z, g):
        ratio = z / (g + EPS)
        st = jnp.sqrt(jnp.clip(1 - ratio ** 2, 0.0, 1.0))
        phase = jnp.arctan2(st, ratio)
        return g * jnp.exp(1j * phase.astype(jnp.complex64))

    c1 = to_c(z1, g1)
    c2 = to_c(z2, g2)
    if mode == "interference":
        te = jnp.sum(jnp.abs(c1) ** 2 + jnp.abs(c2) ** 2, axis=1, keepdims=True)
        r = c1 + c2
        r = r * jnp.sqrt(te) / (jnp.abs(r) + EPS)
    else:
        te1 = jnp.sum(jnp.abs(c1) ** 2, axis=1, keepdims=True)
        te2 = jnp.sum(jnp.abs(c2) ** 2, axis=1, keepdims=True)
        r = c1 * c2
        r = r * jnp.sqrt(te1 * te2) / (jnp.abs(r) + EPS)
    out = jnp.abs(r)
    mean = jnp.mean(out, axis=-1, keepdims=True)
    var = jnp.mean((out - mean) ** 2, axis=-1, keepdims=True)
    out = (out - mean) / jnp.sqrt(var + LN_EPS) * gamma + beta
    pooled = jnp.mean(out, axis=1)
    return pooled @ wc + bc


if __name__ == "__main__":
    vocab_size, D, C = 64, 128, 4   # small synthetic shapes (embedding_dim=128)
    B, S = 2, 8

    key = jax.random.PRNGKey(0)
    k_params, k_ids = jax.random.split(key)
    params = init_params(k_params, vocab_size, D, C)
    input_ids = jax.random.randint(k_ids, (B, S), 0, vocab_size, dtype=jnp.int32)

    ok = True
    for mode in ("modulation", "interference"):
        logits = wave_network_forward(input_ids, params, mode=mode)
        jax.block_until_ready(logits)
        ref = _reference_forward(input_ids, params, mode=mode)
        assert logits.shape == (B, C)
        ok = ok and bool(jnp.allclose(logits, ref, rtol=1e-3, atol=1e-3))
    assert ok

    print("KERNEL_OK")
</pallas_src>

<mosaic_0001>
module attributes {stable_mosaic.version = 11 : i64} {
  func.func @_wave_network_kernel(%arg0: i32, %arg1: memref<2x8x128xf32, #tpu.memory_space<vmem>>, %arg2: memref<128x256xf32, #tpu.memory_space<vmem>>, %arg3: memref<1x256xf32, #tpu.memory_space<vmem>>, %arg4: memref<1x128xf32, #tpu.memory_space<vmem>>, %arg5: memref<1x128xf32, #tpu.memory_space<vmem>>, %arg6: memref<128x128xf32, #tpu.memory_space<vmem>>, %arg7: memref<1x128xf32, #tpu.memory_space<vmem>>, %arg8: memref<2x128xf32, #tpu.memory_space<vmem>>) attributes {dimension_semantics = [#tpu.dimension_semantics<parallel>], iteration_bounds = array<i64: 1>, scalar_prefetch = 0 : i64, scratch_operands = 0 : i64, tpu.core_type = #tpu.core_type<tc>, window_params = [{transform_indices = @transform_0, window_bounds = array<i64: 2, 8, 128>}, {pipeline_mode = #tpu.pipeline_mode<synchronous>, transform_indices = @transform_1, window_bounds = array<i64: 128, 256>}, {pipeline_mode = #tpu.pipeline_mode<synchronous>, transform_indices = @transform_2, window_bounds = array<i64: 1, 256>}, {pipeline_mode = #tpu.pipeline_mode<synchronous>, transform_indices = @transform_3, window_bounds = array<i64: 1, 128>}, {pipeline_mode = #tpu.pipeline_mode<synchronous>, transform_indices = @transform_4, window_bounds = array<i64: 1, 128>}, {pipeline_mode = #tpu.pipeline_mode<synchronous>, transform_indices = @transform_5, window_bounds = array<i64: 128, 128>}, {pipeline_mode = #tpu.pipeline_mode<synchronous>, transform_indices = @transform_6, window_bounds = array<i64: 1, 128>}, {transform_indices = @transform_7, window_bounds = array<i64: 2, 128>}]} {
    %c0 = arith.constant 0 : index
    %c0_0 = arith.constant 0 : index
    %c0_1 = arith.constant 0 : index
    %0 = vector.load %arg1[%c0, %c0_0, %c0_1] : memref<2x8x128xf32, #tpu.memory_space<vmem>>, vector<2x8x128xf32>
    %1 = vector.shape_cast %0 : vector<2x8x128xf32> to vector<16x128xf32>
    %c0_2 = arith.constant 0 : index
    %c0_3 = arith.constant 0 : index
    %2 = vector.load %arg2[%c0_2, %c0_3] : memref<128x256xf32, #tpu.memory_space<vmem>>, vector<128x256xf32>
    %cst = arith.constant dense<0.000000e+00> : vector<16x256xf32>
    %3 = tpu.matmul %1, %2, %cst {dimension_numbers = #tpu.dot_dimension_numbers<[1], [0], [0], [1], [0, 0, 1, 1], [], []>} : vector<16x128xf32>, vector<128x256xf32>, vector<16x256xf32> -> vector<16x256xf32>
    %c0_4 = arith.constant 0 : index
    %c0_5 = arith.constant 0 : index
    %4 = vector.load %arg3[%c0_4, %c0_5] : memref<1x256xf32, #tpu.memory_space<vmem>>, vector<1x256xf32>
    %5 = vector.broadcast %4 : vector<1x256xf32> to vector<16x256xf32>
    %6 = arith.addf %3, %5 : vector<16x256xf32>
    %7 = vector.shape_cast %6 : vector<16x256xf32> to vector<2x8x256xf32>
    %8 = arith.mulf %7, %7 : vector<2x8x256xf32>
    %cst_6 = arith.constant dense<0.000000e+00> : vector<2x256xf32>
    %9 = vector.multi_reduction <add>, %8, %cst_6 [1] : vector<2x8x256xf32> to vector<2x256xf32>
    %10 = vector.extract_strided_slice %9 {offsets = [0, 0], sizes = [2, 128], strides = [1, 1]} : vector<2x256xf32> to vector<2x128xf32>
    %11 = vector.extract_strided_slice %9 {offsets = [0, 128], sizes = [2, 128], strides = [1, 1]} : vector<2x256xf32> to vector<2x128xf32>
    %12 = math.sqrt %10 : vector<2x128xf32>
    %13 = math.sqrt %11 : vector<2x128xf32>
    %14 = arith.mulf %12, %13 : vector<2x128xf32>
    %cst_7 = arith.constant 8.000000e+00 : f32
    %15 = vector.broadcast %cst_7 : f32 to vector<2x128xf32>
    %16 = arith.mulf %15, %14 : vector<2x128xf32>
    %cst_8 = arith.constant 9.99999993E-9 : f32
    %17 = vector.broadcast %cst_8 : f32 to vector<2x128xf32>
    %18 = arith.addf %14, %17 : vector<2x128xf32>
    %19 = arith.divf %16, %18 : vector<2x128xf32>
    %20 = arith.mulf %14, %19 : vector<2x128xf32>
    %cst_9 = arith.constant dense<0.000000e+00> : vector<2xf32>
    %21 = vector.multi_reduction <add>, %20, %cst_9 [1] : vector<2x128xf32> to vector<2xf32>
    %22 = vector.shape_cast %21 : vector<2xf32> to vector<2x1xf32>
    %cst_10 = arith.constant 1.280000e+02 : f32
    %23 = vector.broadcast %cst_10 : f32 to vector<2x1xf32>
    %24 = arith.divf %22, %23 : vector<2x1xf32>
    %25 = vector.broadcast %24 : vector<2x1xf32> to vector<2x128xf32>
    %26 = arith.subf %20, %25 : vector<2x128xf32>
    %27 = arith.mulf %26, %26 : vector<2x128xf32>
    %cst_11 = arith.constant dense<0.000000e+00> : vector<2xf32>
    %28 = vector.multi_reduction <add>, %27, %cst_11 [1] : vector<2x128xf32> to vector<2xf32>
    %29 = vector.shape_cast %28 : vector<2xf32> to vector<2x1xf32>
    %cst_12 = arith.constant 1.280000e+02 : f32
    %30 = vector.broadcast %cst_12 : f32 to vector<2x1xf32>
    %31 = arith.divf %29, %30 : vector<2x1xf32>
    %cst_13 = arith.constant 9.99999974E-6 : f32
    %32 = vector.broadcast %cst_13 : f32 to vector<2x1xf32>
    %33 = arith.addf %31, %32 : vector<2x1xf32>
    %34 = math.rsqrt %33 : vector<2x1xf32>
    %35 = vector.broadcast %34 : vector<2x1xf32> to vector<2x128xf32>
    %36 = arith.mulf %26, %35 : vector<2x128xf32>
    %c0_14 = arith.constant 0 : index
    %c0_15 = arith.constant 0 : index
    %37 = vector.load %arg4[%c0_14, %c0_15] : memref<1x128xf32, #tpu.memory_space<vmem>>, vector<1x128xf32>
    %38 = vector.broadcast %37 : vector<1x128xf32> to vector<2x128xf32>
    %39 = arith.mulf %36, %38 : vector<2x128xf32>
    %c0_16 = arith.constant 0 : index
    %c0_17 = arith.constant 0 : index
    %40 = vector.load %arg5[%c0_16, %c0_17] : memref<1x128xf32, #tpu.memory_space<vmem>>, vector<1x128xf32>
    %41 = vector.broadcast %40 : vector<1x128xf32> to vector<2x128xf32>
    %42 = arith.addf %39, %41 : vector<2x128xf32>
    %c0_18 = arith.constant 0 : index
    %c0_19 = arith.constant 0 : index
    %43 = vector.load %arg6[%c0_18, %c0_19] : memref<128x128xf32, #tpu.memory_space<vmem>>, vector<128x128xf32>
    %cst_20 = arith.constant dense<0.000000e+00> : vector<2x128xf32>
    %44 = tpu.matmul %42, %43, %cst_20 {dimension_numbers = #tpu.dot_dimension_numbers<[1], [0], [0], [1], [0, 0, 1, 1], [], []>} : vector<2x128xf32>, vector<128x128xf32>, vector<2x128xf32> -> vector<2x128xf32>
    %c0_21 = arith.constant 0 : index
    %c0_22 = arith.constant 0 : index
    %45 = vector.load %arg7[%c0_21, %c0_22] : memref<1x128xf32, #tpu.memory_space<vmem>>, vector<1x128xf32>
    %46 = vector.broadcast %45 : vector<1x128xf32> to vector<2x128xf32>
    %47 = arith.addf %44, %46 : vector<2x128xf32>
    %c0_23 = arith.constant 0 : index
    %c0_24 = arith.constant 0 : index
    %48 = vector.load %arg8[%c0_23, %c0_24] : memref<2x128xf32, #tpu.memory_space<vmem>>, vector<2x128xf32>
    tpu.vector_store %arg8[%c0_23, %c0_24], %47 {strides = array<i32>} : memref<2x128xf32, #tpu.memory_space<vmem>>, vector<2x128xf32>,
    return
  }
  func.func @transform_0(%arg0: i32) -> (i32, i32, i32) {
    %c0_i32 = arith.constant 0 : i32
    %c0_i32_0 = arith.constant 0 : i32
    %c0_i32_1 = arith.constant 0 : i32
    return %arg0, %c0_i32, %c0_i32_0 : i32, i32, i32
  }
  func.func @transform_1(%arg0: i32) -> (i32, i32) {
    %c0_i32 = arith.constant 0 : i32
    %c0_i32_0 = arith.constant 0 : i32
    %c0_i32_1 = arith.constant 0 : i32
    return %c0_i32, %c0_i32_0 : i32, i32
  }
  func.func @transform_2(%arg0: i32) -> (i32, i32) {
    %c0_i32 = arith.constant 0 : i32
    %c0_i32_0 = arith.constant 0 : i32
    %c0_i32_1 = arith.constant 0 : i32
    return %c0_i32, %c0_i32_0 : i32, i32
  }
  func.func @transform_3(%arg0: i32) -> (i32, i32) {
    %c0_i32 = arith.constant 0 : i32
    %c0_i32_0 = arith.constant 0 : i32
    %c0_i32_1 = arith.constant 0 : i32
    return %c0_i32, %c0_i32_0 : i32, i32
  }
  func.func @transform_4(%arg0: i32) -> (i32, i32) {
    %c0_i32 = arith.constant 0 : i32
    %c0_i32_0 = arith.constant 0 : i32
    %c0_i32_1 = arith.constant 0 : i32
    return %c0_i32, %c0_i32_0 : i32, i32
  }
  func.func @transform_5(%arg0: i32) -> (i32, i32) {
    %c0_i32 = arith.constant 0 : i32
    %c0_i32_0 = arith.constant 0 : i32
    %c0_i32_1 = arith.constant 0 : i32
    return %c0_i32, %c0_i32_0 : i32, i32
  }
  func.func @transform_6(%arg0: i32) -> (i32, i32) {
    %c0_i32 = arith.constant 0 : i32
    %c0_i32_0 = arith.constant 0 : i32
    %c0_i32_1 = arith.constant 0 : i32
    return %c0_i32, %c0_i32_0 : i32, i32
  }
  func.func @transform_7(%arg0: i32) -> (i32, i32) {
    %c0_i32 = arith.constant 0 : i32
    %c0_i32_0 = arith.constant 0 : i32
    return %arg0, %c0_i32 : i32, i32
  }
}

</mosaic_0001>

<bundles_post_ra>
// kernel: tpu_custom_call.1
= control target key start
LH: loop header
LB: loop body
LE: loop exit
PB: predicated region body
PF: predicated region fallthrough
CT: control target
= control target key end

     0   :  { %12 = vsyncpa [#allocation3], 0  ;;  %s777_s0 = inlined_call_operand.hbm [shape: f32[2,8,128], index: 0, kind: input, shape index: {}]   ;;  %s778_s1 = inlined_call_operand.hbm [shape: f32[128,256], index: 1, kind: input, shape index: {}]   ;;  %s779_s2 = inlined_call_operand.vmem [shape: f32[1,256], index: 2, kind: input, shape index: {}]   ;;  %s780_s3 = inlined_call_operand.vmem [shape: f32[1,128], index: 3, kind: input, shape index: {}]   ;;  %s781_s4 = inlined_call_operand.vmem [shape: f32[1,128], index: 4, kind: input, shape index: {}]   ;;  %s782_s5 = inlined_call_operand.hbm [shape: f32[128,128], index: 5, kind: input, shape index: {}]   ;;  %s783_s6 = inlined_call_operand.vmem [shape: f32[1,128], index: 6, kind: input, shape index: {}]   ;;  %s784_s7 = inlined_call_operand.hbm [shape: f32[2,128], index: 7, kind: output, shape index: {}]  }
   0x1   :  { %13 = vsyncpa [#allocation6], 0 }
   0x2   :  { %14 = vsyncpa [#allocation4], 0  ;;  %s658_s24 = smov [#allocation5]   ;;  %s564_s28 = scalar_lea.hbm %s778_s1, 4096 }
   0x3   :  { %s32_s25 = sshll.u32 %s658_s24, 4  ;;  %p565_p0 = scmp.ne.s32.totalorder %s778_s1, %s564_s28  ;;  %s33_s25 = int_to_ptr.vmem [resolvable:$true] %s32_s25 }
   0x4   :  { %p568_p1 = scmp.lt.u32.totalorder %s564_s28, %s778_s1 }
   0x6   :  { %p570_p2 = pnand %p568_p1, %p565_p0 }
   0x8   :  { %573 = shalt.err (!%p570_p2)
}
   0x9   :  { %s574_s10 = scalar_lea.vmem %s33_s25, 4096  ;;  %p579_p4 = scmp.lt.s32.totalorder %s33_s25, %s33_s25 }
   0xa   :  { %p575_p3 = scmp.ne.s32.totalorder %s33_s25, %s574_s10  ;;  %p580_p5 = scmp.lt.s32.totalorder %s574_s10, %s574_s10 }
   0xc   :  { %p581_p6 = por %p580_p5, %p579_p4 }
   0xe   :  { %p582_p7 = pnand %p581_p6, %p575_p3 }
  0x10   :  { %585 = shalt.err (!%p582_p7)
}
  0x11   :  { %s659_s11 = smov 256   ;;  %s660_s12 = smov 16  }
  0x12   :  { %38 = dma.hbm_to_vmem [thread:$0]  %s778_s1, 4096, %s33_s25, [#allocation6], %s659_s11, %s659_s11, %s660_s12  }
  0x13   :  { %s661_s15 = smov [#allocation2]   ;;  %s586_s19 = scalar_lea.hbm %s777_s0, 256 }
  0x14   :  { %s20_s16 = sshll.u32 %s661_s15, 4  ;;  %p587_p8 = scmp.ne.s32.totalorder %s777_s0, %s586_s19  ;;  %s21_s16 = int_to_ptr.vmem [resolvable:$true] %s20_s16 }
  0x15   :  { %p590_p9 = scmp.lt.u32.totalorder %s586_s19, %s777_s0 }
  0x17   :  { %p592_p10 = pnand %p590_p9, %p587_p8 }
  0x19   :  { %595 = shalt.err (!%p592_p10)
}
  0x1a   :  { %s596_s24 = scalar_lea.vmem %s21_s16, 256  ;;  %p601_p12 = scmp.lt.s32.totalorder %s21_s16, %s21_s16 }
  0x1b   :  { %p597_p11 = scmp.ne.s32.totalorder %s21_s16, %s596_s24  ;;  %p602_p13 = scmp.lt.s32.totalorder %s596_s24, %s596_s24 }
  0x1d   :  { %p603_p0 = por %p602_p13, %p601_p12 }
  0x1f   :  { %p604_p1 = pnand %p603_p0, %p597_p11 }
  0x21   :  { %607 = shalt.err (!%p604_p1)
}
  0x22   :  { %s662_s1 = smov 128   ;;  %s663_s25 = smov 8  }
  0x23   :  { %26 = dma.hbm_to_vmem [thread:$0]  %s777_s0, 256, %s21_s16, [#allocation3], %s662_s1, %s662_s1, %s663_s25  }
  0x24   :  { %s664_s28 = smov [#allocation7]   ;;  %s608_s9 = scalar_lea.hbm %s782_s5, 2048 }
  0x25   :  { %s50_s29 = sshll.u32 %s664_s28, 4  ;;  %p609_p2 = scmp.ne.s32.totalorder %s782_s5, %s608_s9  ;;  %s51_s29 = int_to_ptr.vmem [resolvable:$true] %s50_s29 }
  0x26   :  { %p612_p3 = scmp.lt.u32.totalorder %s608_s9, %s782_s5 }
  0x28   :  { %p614_p4 = pnand %p612_p3, %p609_p2 }
  0x2a   :  { %617 = shalt.err (!%p614_p4)
}
  0x2b   :  { %s618_s14 = scalar_lea.vmem %s51_s29, 2048  ;;  %p623_p6 = scmp.lt.s32.totalorder %s51_s29, %s51_s29 }
  0x2c   :  { %p619_p5 = scmp.ne.s32.totalorder %s51_s29, %s618_s14  ;;  %p624_p7 = scmp.lt.s32.totalorder %s618_s14, %s618_s14 }
  0x2e   :  { %p625_p8 = por %p624_p7, %p623_p6 }
  0x30   :  { %p626_p9 = pnand %p625_p8, %p619_p5 }
  0x32   :  { %629 = shalt.err (!%p626_p9)
}
  0x33   :  { %56 = dma.hbm_to_vmem [thread:$0]  %s782_s5, 2048, %s51_s29, [#allocation6], %s662_s1, %s662_s1, %s663_s25  }
  0x34   :  { %652 = dma.done.wait [#allocation3], 256  }
  0x35   :  { %653 = vsyncadd [#allocation3], 4294967040 }
  0x36   :  { %654 = dma.done.wait [#allocation6], 6144  }
  0x37   :  { %655 = vsyncadd [#allocation6], 4294961152  ;;  %v665_v0 = vmov 0.0   ;;  %v71_v1 = vld [vmem:[#allocation5 + $0x8] sm:$0xff]  ;;  %v73_v2 = vld [vmem:[#allocation5 + $0x18] sm:$0xff]  ;;  %v104_v51 = vlaneseq  ;;  %vm261_vm8 = vcmask 1041409  }
  0x38   :  { %178 = vmatprep.mubr.f32.mxu0 %v665_v0  ;;  %v70_v3 = vld [vmem:[#allocation5] sm:$0xff]  ;;  %v483_v4 = vpack.c.bf16 %v73_v2, %v71_v1  ;;  %v72_v5 = vld [vmem:[#allocation5 + $0x10] sm:$0xff]  ;;  %v75_v6 = vld [vmem:[#allocation5 + $0x28] sm:$0xff]  ;;  %vm264_vm9 = vcmask 1041408   ;;  %vm667_vm10 = vmmov 0   ;;  %s668_s22 = smov [#allocation8]  }
  0x39   :  { %v77_v7 = vld [vmem:[#allocation5 + $0x38] sm:$0xff]  ;;  %v485_v8 = vpack.c.bf16 %v72_v5, %v70_v3  ;;  %v74_v10 = vld [vmem:[#allocation5 + $0x20] sm:$0xff]  ;;  %v76_v11 = vld [vmem:[#allocation5 + $0x30] sm:$0xff]  ;;  %v105_v52 = vshrl.u32 %v104_v51, 7  ;;  %480 = vmatprep.mubr.msk.f32.mxu1 %vm667_vm10, %v665_v0  ;;  %s418_s23 = sshll.u32 %s668_s22, 4  ;;  %s419_s23 = int_to_ptr.vmem [resolvable:$true] %s418_s23 }
  0x3a   :  { %v487_v9 = vpack.c.bf16 %v77_v7, %v75_v6  ;;  %v79_v12 = vld [vmem:[#allocation5 + $0x48] sm:$0xff]  ;;  %484 = vmatprep.subr.bf16.mxu0 %v483_v4  ;;  %v81_v13 = vld [vmem:[#allocation5 + $0x58] sm:$0xff]  ;;  %v489_v14 = vpack.c.bf16 %v76_v11, %v74_v10  ;;  %v78_v16 = vld [vmem:[#allocation5 + $0x40] sm:$0xff]  ;;  %p635_p11 = scmp.lt.s32.totalorder %s419_s23, %s419_s23 }
  0x3b   :  { %486 = vmatpush1.bf16.msra.mxu0 %v485_v8  ;;  %v491_v15 = vpack.c.bf16 %v81_v13, %v79_v12  ;;  %v80_v17 = vld [vmem:[#allocation5 + $0x50] sm:$0xff]  ;;  %v83_v18 = vld [vmem:[#allocation5 + $0x68] sm:$0xff]  ;;  %v85_v19 = vld [vmem:[#allocation5 + $0x78] sm:$0xff]  ;;  %v106_v53 = vsub.s32 0, %v105_v52  ;;  %v110_v55 = vsub.s32 1, %v105_v52 }
  0x3c   :  { %488 = vmatprep.subr.bf16.mxu0 %v487_v9  ;;  %v493_v20 = vpack.c.bf16 %v80_v17, %v78_v16  ;;  %v495_v21 = vpack.c.bf16 %v85_v19, %v83_v18  ;;  %v82_v22 = vld [vmem:[#allocation5 + $0x60] sm:$0xff]  ;;  %v84_v23 = vld [vmem:[#allocation5 + $0x70] sm:$0xff]  ;;  %v87_v24 = vld [vmem:[#allocation5 + $0x88] sm:$0xff] }
  0x3d   :  { %v89_v25 = vld [vmem:[#allocation5 + $0x98] sm:$0xff]  ;;  %v497_v26 = vpack.c.bf16 %v84_v23, %v82_v22  ;;  %v86_v28 = vld [vmem:[#allocation5 + $0x80] sm:$0xff]  ;;  %v88_v29 = vld [vmem:[#allocation5 + $0x90] sm:$0xff] }
  0x3e   :  { %v499_v27 = vpack.c.bf16 %v89_v25, %v87_v24  ;;  %v91_v30 = vld [vmem:[#allocation5 + $0xa8] sm:$0xff]  ;;  %v93_v31 = vld [vmem:[#allocation5 + $0xb8] sm:$0xff]  ;;  %v501_v32 = vpack.c.bf16 %v88_v29, %v86_v28  ;;  %v90_v34 = vld [vmem:[#allocation5 + $0xa0] sm:$0xff] }
  0x3f   :  { %490 = vmatpush1.bf16.msra.mxu0 %v489_v14  ;;  %v503_v33 = vpack.c.bf16 %v93_v31, %v91_v30  ;;  %v92_v35 = vld [vmem:[#allocation5 + $0xb0] sm:$0xff]  ;;  %v95_v36 = vld [vmem:[#allocation5 + $0xc8] sm:$0xff]  ;;  %v97_v37 = vld [vmem:[#allocation5 + $0xd8] sm:$0xff] }
  0x40   :  { %492 = vmatprep.subr.bf16.mxu0 %v491_v15  ;;  %v505_v38 = vpack.c.bf16 %v92_v35, %v90_v34  ;;  %v507_v39 = vpack.c.bf16 %v97_v37, %v95_v36  ;;  %v94_v40 = vld [vmem:[#allocation5 + $0xc0] sm:$0xff]  ;;  %v96_v41 = vld [vmem:[#allocation5 + $0xd0] sm:$0xff]  ;;  %v99_v42 = vld [vmem:[#allocation5 + $0xe8] sm:$0xff] }
  0x41   :  { %v101_v43 = vld [vmem:[#allocation5 + $0xf8] sm:$0xff]  ;;  %v509_v44 = vpack.c.bf16 %v96_v41, %v94_v40  ;;  %v98_v46 = vld [vmem:[#allocation5 + $0xe0] sm:$0xff]  ;;  %v100_v47 = vld [vmem:[#allocation5 + $0xf0] sm:$0xff] }
  0x42   :  { %v511_v45 = vpack.c.bf16 %v101_v43, %v99_v42  ;;  %v513_v48 = vpack.c.bf16 %v100_v47, %v98_v46  ;;  %v68_v49 = vld [vmem:[#allocation2] sm:$0xff]  ;;  %v69_v50 = vld [vmem:[#allocation2 + $0x8] sm:$0xff] }
  0x43   :  { %494 = vmatpush1.bf16.msra.mxu0 %v493_v20  ;;  %v102_v54 = vld [vmem:[%s779_s2] sm:$0x3] }
  0x44   :  { %496 = vmatprep.subr.bf16.mxu0 %v495_v21  ;;  %v107_v56 = vrot.slane %v102_v54, %v106_v53  ;;  %v111_v57 = vrot.slane %v102_v54, %v110_v55 }
  0x47   :  { %498 = vmatpush1.bf16.msra.mxu0 %v497_v26 }
  0x48   :  { %500 = vmatprep.subr.bf16.mxu0 %v499_v27 }
  0x4b   :  { %502 = vmatpush1.bf16.msra.mxu0 %v501_v32 }
  0x4c   :  { %504 = vmatprep.subr.bf16.mxu0 %v503_v33 }
  0x4f   :  { %506 = vmatpush1.bf16.msra.mxu0 %v505_v38 }
  0x50   :  { %508 = vmatprep.subr.bf16.mxu0 %v507_v39 }
  0x53   :  { %510 = vmatpush1.bf16.msra.mxu0 %v509_v44 }
  0x54   :  { %512 = vmatprep.subr.bf16.mxu0 %v511_v45 }
  0x57   :  { %514 = vmatpush1.bf16.msra.mxu0 %v513_v48 }
  0x5a   :  { %179 = vmatmul.mubr.f32.vlgmr.msra.gmra.mrb[0].mxu0 %v68_v49 }
  0x5b   :  { %184 = vmatprep.mubr.f32.mxu0 %v665_v0 }
  0x5e   :  { %185 = vmatmul.mubr.f32.gmra.mrb[2].mxu0 %v69_v50 }
 0x12d   :  { %v180_v58 = vpop.f32.mrb[0].mxu0 }
 0x12e   :  { %v181_v59 = vadd.f32 %v180_v58, %v107_v56  ;;  %v182_v60 = vpop.f32.mrb[1].mxu0 }
 0x12f   :  { %v183_v61 = vadd.f32 %v182_v60, %v111_v57 }
 0x130   :  { %v191_v62 = vmul.f32 %v181_v59, %v181_v59 }
 0x131   :  { %v192_v63 = vmul.f32 %v183_v61, %v183_v61  ;;  %v186_v1 = vpop.f32.mrb[2].mxu0 }
 0x132   :  { %v195_v2 = vrot.slane %v191_v62, 4  ;;  %v187_v3 = vadd.f32 %v186_v1, %v107_v56  ;;  %v188_v4 = vpop.f32.mrb[3].mxu0 }
 0x133   :  { %v201_v5 = vrot.slane %v192_v63, 4  ;;  %v189_v6 = vadd.f32 %v188_v4, %v111_v57  ;;  %v315_v4 = vld [vmem:[#allocation7 + $0x10] sm:$0xff] }
 0x134   :  { %v196_v7 = vadd.f32 %v195_v2, %v191_v62  ;;  %v193_v8 = vmul.f32 %v187_v3, %v187_v3  ;;  %v313_v2 = vld [vmem:[#allocation7] sm:$0xff]  ;;  %v314_v3 = vld [vmem:[#allocation7 + $0x8] sm:$0xff] }
 0x135   :  { %v202_v9 = vadd.f32 %v201_v5, %v192_v63  ;;  %v194_v10 = vmul.f32 %v189_v6, %v189_v6  ;;  %v666_v5 = vmov 0.0|0.0   ;;  %v516_v6 = vpack.c.bf16 %v314_v3, %v313_v2 }
 0x136   :  { %v197_v11 = vrot.slane %v196_v7, 2  ;;  %v207_v12 = vrot.slane %v193_v8, 4  ;;  %515 = vmatprep.subr.bf16.mxu1 %v666_v5 }
 0x137   :  { %v203_v13 = vrot.slane %v202_v9, 2  ;;  %v213_v14 = vrot.slane %v194_v10, 4  ;;  %517 = vmatpush3.bf16.msra.mxu1 %v516_v6 }
 0x138   :  { %v198_v15 = vadd.f32 %v197_v11, %v196_v7  ;;  %v208_v16 = vadd.f32 %v207_v12, %v193_v8  ;;  %v316_v7 = vld [vmem:[#allocation7 + $0x18] sm:$0xff]  ;;  %518 = vmatprep.subr.bf16.mxu1 %v666_v5 }
 0x139   :  { %v204_v17 = vadd.f32 %v203_v13, %v202_v9  ;;  %v214_v18 = vadd.f32 %v213_v14, %v194_v10  ;;  %v519_v8 = vpack.c.bf16 %v316_v7, %v315_v4 }
 0x13a   :  { %v199_v19 = vrot.slane %v198_v15, 1  ;;  %v209_v20 = vrot.slane %v208_v16, 2 }
 0x13b   :  { %v205_v21 = vrot.slane %v204_v17, 1  ;;  %v215_v22 = vrot.slane %v214_v18, 2  ;;  %520 = vmatpush3.bf16.msra.mxu1 %v519_v8 }
 0x13c   :  { %v200_v23 = vadd.f32 %v199_v19, %v198_v15  ;;  %v210_v24 = vadd.f32 %v209_v20, %v208_v16  ;;  %521 = vmatprep.subr.bf16.mxu1 %v666_v5  ;;  %v317_v19 = vld [vmem:[#allocation7 + $0x20] sm:$0xff]  ;;  %v318_v20 = vld [vmem:[#allocation7 + $0x28] sm:$0xff] }
 0x13d   :  { %v206_v25 = vadd.f32 %v205_v21, %v204_v17  ;;  %v216_v26 = vadd.f32 %v215_v22, %v214_v18  ;;  %v522_v21 = vpack.c.bf16 %v318_v20, %v317_v19  ;;  %v319_v22 = vld [vmem:[#allocation7 + $0x30] sm:$0xff] }
 0x13e   :  { %550 = vrsqrt.f32 %v200_v23  ;;  %v211_v27 = vrot.slane %v210_v24, 1  ;;  %vm221_vm0 = vcmp.eq.f32.partialorder %v200_v23, inf  ;;  %v224_v34 = vand.u32 2147483648, %v200_v23 }
 0x13f   :  { %552 = vrsqrt.f32 %v206_v25  ;;  %v217_v28 = vrot.slane %v216_v26, 1  ;;  %vm223_vm1 = vcmp.eq.f32.partialorder %v200_v23, 0.0  ;;  %vm235_vm2 = vcmp.eq.f32.partialorder %v206_v25, inf  ;;  %523 = vmatpush3.bf16.msra.mxu1 %v522_v21 }
 0x140   :  { %v212_v29 = vadd.f32 %v211_v27, %v210_v24  ;;  %v238_v37 = vand.u32 2147483648, %v206_v25  ;;  %vm237_vm3 = vcmp.eq.f32.partialorder %v206_v25, 0.0  ;;  %524 = vmatprep.subr.bf16.mxu1 %v666_v5 }
 0x141   :  { %v218_v30 = vadd.f32 %v217_v28, %v216_v26  ;;  %v322_v26 = vld [vmem:[#allocation7 + $0x48] sm:$0xff]  ;;  %v323_v28 = vld [vmem:[#allocation7 + $0x50] sm:$0xff] }
 0x142   :  { %554 = vrsqrt.f32 %v212_v29  ;;  %vm228_vm4 = vcmp.eq.f32.partialorder %v212_v29, inf  ;;  %v231_v44 = vand.u32 2147483648, %v212_v29  ;;  %vm230_vm5 = vcmp.eq.f32.partialorder %v212_v29, 0.0 }
 0x143   :  { %556 = vrsqrt.f32 %v218_v30  ;;  %vm242_vm6 = vcmp.eq.f32.partialorder %v218_v30, inf  ;;  %v245_v48 = vand.u32 2147483648, %v218_v30  ;;  %vm244_vm7 = vcmp.eq.f32.partialorder %v218_v30, 0.0 }
 0x148   :  { %v551_v31 = vpop.eup %550 }
 0x149   :  { %v553_v32 = vpop.eup %552  ;;  %v220_v33 = vmul.f32 %v551_v31, %v200_v23  ;;  %v325_v31 = vld [vmem:[#allocation7 + $0x60] sm:$0xff] }
 0x14a   :  { %v234_v35 = vmul.f32 %v553_v32, %v206_v25  ;;  %v326_v32 = vld [vmem:[#allocation7 + $0x68] sm:$0xff] }
 0x14b   :  { %v222_v36 = vsel %vm221_vm0, %v200_v23, %v220_v33  ;;  %v320_v23 = vld [vmem:[#allocation7 + $0x38] sm:$0xff]  ;;  %v534_v33 = vpack.c.bf16 %v326_v32, %v325_v31 }
 0x14c   :  { %v555_v38 = vpop.eup %554  ;;  %v225_v39 = vsel %vm223_vm1, %v224_v34, %v222_v36  ;;  %v236_v40 = vsel %vm235_vm2, %v206_v25, %v234_v35  ;;  %v525_v24 = vpack.c.bf16 %v320_v23, %v319_v22  ;;  %v321_v25 = vld [vmem:[#allocation7 + $0x40] sm:$0xff]  ;;  %v327_v34 = vld [vmem:[#allocation7 + $0x70] sm:$0xff]  ;;  %v328_v35 = vld [vmem:[#allocation7 + $0x78] sm:$0xff] }
 0x14d   :  { %v557_v41 = vpop.eup %556  ;;  %v227_v42 = vmul.f32 %v555_v38, %v212_v29  ;;  %v239_v43 = vsel %vm237_vm3, %v238_v37, %v236_v40  ;;  %v528_v27 = vpack.c.bf16 %v322_v26, %v321_v25  ;;  %v537_v36 = vpack.c.bf16 %v328_v35, %v327_v34 }
 0x14e   :  { %v241_v45 = vmul.f32 %v557_v41, %v218_v30  ;;  %v247_v46 = vmul.f32 %v239_v43, %v225_v39  ;;  %526 = vmatpush3.bf16.msra.mxu1 %v525_v24  ;;  %v428_v43 = vld [vmem:[%s780_s3] ss:$0 sm:$0xff]  ;;  %s630_s3 = scalar_lea.vmem %s419_s23, 32 }
 0x14f   :  { %v229_v47 = vsel %vm228_vm4, %v212_v29, %v227_v42  ;;  %527 = vmatprep.subr.bf16.mxu1 %v666_v5  ;;  %v324_v29 = vld [vmem:[#allocation7 + $0x58] sm:$0xff]  ;;  %p631_p10 = scmp.ne.s32.totalorder %s419_s23, %s630_s3  ;;  %p636_p12 = scmp.lt.s32.totalorder %s630_s3, %s630_s3 }
 0x150   :  { %v232_v49 = vsel %vm230_vm5, %v231_v44, %v229_v47  ;;  %v243_v50 = vsel %vm242_vm6, %v218_v30, %v241_v45  ;;  %v251_v51 = vadd.f32 1e-08, %v247_v46  ;;  %v249_v56 = vmul.f32 8.0, %v247_v46 }
 0x151   :  { %v246_v52 = vsel %vm244_vm7, %v245_v48, %v243_v50  ;;  %v531_v30 = vpack.c.bf16 %v324_v29, %v323_v28  ;;  %p637_p13 = por %p636_p12, %p635_p11 }
 0x152   :  { %v248_v53 = vmul.f32 %v246_v52, %v232_v49  ;;  %558 = vrcp.f32 %v251_v51  ;;  %529 = vmatpush3.bf16.msra.mxu1 %v528_v27  ;;  %v430_v51 = vld [vmem:[%s783_s6] ss:$0 sm:$0xff] }
 0x153   :  { %530 = vmatprep.subr.bf16.mxu1 %v666_v5  ;;  %p638_p0 = pnand %p637_p13, %p631_p10 }
 0x154   :  { %v252_v54 = vadd.f32 1e-08, %v248_v53  ;;  %v250_v57 = vmul.f32 8.0, %v248_v53 }
 0x156   :  { %560 = vrcp.f32 %v252_v54  ;;  %532 = vmatpush3.bf16.msra.mxu1 %v531_v30 }
 0x157   :  { %533 = vmatprep.subr.bf16.mxu1 %v666_v5 }
 0x15a   :  { %535 = vmatpush3.bf16.msra.mxu1 %v534_v33 }
 0x15b   :  { %536 = vmatprep.subr.bf16.mxu1 %v666_v5 }
 0x15c   :  { %v559_v55 = vpop.eup %558 }
 0x15d   :  { %v254_v58 = vmul.f32 %v559_v55, %v249_v56 }
 0x15e   :  { %538 = vmatpush3.bf16.msra.mxu1 %v537_v36 }
 0x15f   :  { %v257_v61 = vmul.f32 %v254_v58, %v247_v46  ;;  %v429_v46 = vld [vmem:[%s781_s4] ss:$0 sm:$0xff] }
 0x160   :  { %v561_v59 = vpop.eup %560 }
 0x161   :  { %v256_v60 = vmul.f32 %v561_v59, %v250_v57 }
 0x163   :  { %v258_v62 = vmul.f32 %v256_v60, %v248_v53 }
 0x165   :  { %v262_v63 = vsel %vm261_vm8, %v258_v62, %v257_v61 }
 0x166   :  { %v265_v1 = vsel %vm264_vm9, %v262_v63, 0.0 }
 0x167   :  { %266 = vadd.xlane.f32.xlu0 %v265_v1 }
 0x1f4   :  { %v267_v9 = vpop.xlane.xlu0 %266 }
 0x1f5   :  { %v269_v10 = vmul.f32 0.0078125, %v267_v9 }
 0x1f7   :  { %v271_v11 = vrot.slane %v269_v10, 1  ;;  %v274_v12 = vsub.f32 %v257_v61, %v269_v10 }
 0x1f9   :  { %v275_v13 = vsub.f32 %v258_v62, %v271_v11  ;;  %v276_v15 = vmul.f32 %v274_v12, %v274_v12 }
 0x1fb   :  { %v277_v14 = vmul.f32 %v275_v13, %v275_v13 }
 0x1fd   :  { %v280_v16 = vrot.slane %v277_v14, 7 }
 0x1ff   :  { %v281_v17 = vsel %vm261_vm8, %v280_v16, %v276_v15 }
 0x200   :  { %v283_v18 = vsel %vm264_vm9, %v281_v17, 0.0 }
 0x201   :  { %284 = vadd.xlane.f32.xlu0 %v283_v18 }
 0x28e   :  { %v285_v37 = vpop.xlane.xlu0 %284 }
 0x28f   :  { %v286_v38 = vmul.f32 0.0078125, %v285_v37 }
 0x291   :  { %v287_v39 = vadd.f32 1e-05, %v286_v38 }
 0x293   :  { %562 = vrsqrt.f32 %v287_v39 }
 0x29d   :  { %v563_v40 = vpop.eup %562 }
 0x29e   :  { %v290_v41 = vrot.slane %v563_v40, 1  ;;  %v293_v42 = vmul.f32 %v563_v40, %v274_v12 }
 0x2a0   :  { %v294_v44 = vmul.f32 %v290_v41, %v275_v13  ;;  %v302_v0 = vmul.f32 %v428_v43, %v293_v42 }
 0x2a2   :  { %v303_v45 = vmul.f32 %v428_v43, %v294_v44  ;;  %v311_v48 = vadd.f32 %v429_v46, %v302_v0 }
 0x2a4   :  { %v312_v47 = vadd.f32 %v429_v46, %v303_v45 }
 0x2a6   :  { %v338_v49 = vrot.slane %v312_v47, 7 }
 0x2a8   :  { %v339_v50 = vsel %vm261_vm8, %v338_v49, %v311_v48 }
 0x2a9   :  { %481 = vmatmul.mubr.f32.vlgmr.msra.gmra.mrb[0].mxu1 %v339_v50 }
 0x37c   :  { %v407_v52 = vpop.f32.mrb[0].mxu1 }
 0x37d   :  { %v408_v53 = vadd.f32 %v430_v51, %v407_v52  ;;  %v482_v54 = vpop.f32.mrb[1].mxu1 }
 0x37f   :  { %411 = vst [vmem:[#allocation8] sm:$0x3] %v408_v53 }
 0x380   :  { %641 = shalt.err (!%p638_p0)
}
 0x381   :  { %s642_s1 = scalar_lea.hbm %s784_s7, 32 }
 0x382   :  { %p643_p1 = scmp.ne.s32.totalorder %s784_s7, %s642_s1  ;;  %p646_p2 = scmp.lt.u32.totalorder %s642_s1, %s784_s7 }
 0x384   :  { %p648_p3 = pnand %p646_p2, %p643_p1 }
 0x386   :  { %651 = shalt.err (!%p648_p3)
}
 0x387   :  { %421 = dma.vmem_to_hbm [thread:$0]  %s419_s23, 32, %s784_s7, [#allocation4]  }
 0x388   :  { %656 = dma.done.wait [#allocation4], 32  }
 0x389   :  { %657 = vsyncadd [#allocation4], 4294967264 }
 0x38a   :  { %425 = vsyncpa [#allocation3], 1 }
 0x38b   :  { %426 = vsyncpa [#allocation6], 1 }
 0x38c   :  { %427 = vsyncpa [#allocation4], 1 }

</bundles_post_ra>
